<compile_context>
chip_gen: v5e
topology: v5e:2x2
jax: 0.10.0
libtpu: 0.0.40
codegen_flags: <defaults>
</compile_context>

<pallas_src>
import jax
import jax.numpy as jnp
import numpy as np
from jax import lax
from jax.experimental import pallas as pl
from jax.experimental.pallas import tpu as pltpu


def _rope_kernel(x_ref, cos_ref, sin_ref, o_ref):
    # x_ref/o_ref: (tile_r, W) tile of x (batch squeezed); cos_ref/sin_ref:
    # matching (tile_r, W) tables (sign already folded into sin_ref).
    rows, width = x_ref.shape
    x = x_ref[...]

    # Pair swap: even lanes take x[k+1], odd lanes take x[k-1]; the
    # wrap-around lanes are always masked out by the parity select (W even).
    x_next = pltpu.roll(x, shift=width - 1, axis=1)   # x_next[k] = x[(k+1) % W]
    x_prev = pltpu.roll(x, shift=1, axis=1)           # x_prev[k] = x[(k-1) % W]
    lane = lax.broadcasted_iota(jnp.int32, (rows, width), 1)
    sin_x = jnp.where((lane & 1) == 0, x_next, x_prev)

    out = (x.astype(jnp.float32) * cos_ref[...].astype(jnp.float32)
           + sin_x.astype(jnp.float32) * sin_ref[...].astype(jnp.float32))
    o_ref[...] = out.astype(o_ref.dtype)


def _rope_tables(S, E, base, dtype):
    """cos(theta) and sign-folded sin(theta) as (S, E) arrays of `dtype`."""
    pos = jnp.arange(S, dtype=jnp.float32)[:, None]
    k = jnp.arange(E)
    inv_freq = jnp.float32(base) ** (-2.0 * (k // 2).astype(jnp.float32) / E)
    theta = pos * inv_freq
    cos = jnp.cos(theta)
    sign = jnp.where((k % 2) == 0, -1.0, 1.0).astype(jnp.float32)
    sin_signed = jnp.sin(theta) * sign
    return cos.astype(dtype), sin_signed.astype(dtype)


def _vmem_capacity_bytes():
    """Per-core VMEM capacity; conservative fallback (v7x = 64 MiB)."""
    try:
        info = pltpu.get_tpu_info()
        cap = getattr(info, "vmem_capacity_bytes", None)
        if cap:
            return int(cap)
    except Exception:
        pass
    return 64 * 1024 * 1024


def _pick_tile(rows, width, x_itemsize, tbl_itemsize):
    """Row tile, grid size (cdiv), and an explicit vmem_limit_bytes."""
    # Dtype-native sublane multiple: 8 (f32) / 16 (bf16) / 32 (int8/fp8).
    sublane = max(8, 32 // x_itemsize)
    # Double-buffered working set per row of `width` lanes:
    #   2x input + 2x output (x dtype) + 2x cos + 2x sin (table dtype).
    bytes_per_row = 4 * width * x_itemsize + 4 * width * tbl_itemsize
    vmem_cap = _vmem_capacity_bytes()
    # ~1/3 of VMEM for the working set, capped at 40 MiB (keeps the v7x
    # 64 MiB core comfortable; v5e/v6e's 128 MiB easily covers the cap).
    budget = min(max(vmem_cap // 3, 12 * 1024 * 1024), 40 * 1024 * 1024)
    max_rows = max(sublane, budget // bytes_per_row)
    if rows <= max_rows:
        tile = rows                       # full-extent block, always legal
    else:
        tile = (max_rows // sublane) * sublane
    grid_r = pl.cdiv(rows, tile)
    working = tile * bytes_per_row
    vmem_limit = int(min(vmem_cap - 8 * 1024 * 1024,
                         max(32 * 1024 * 1024, working + 16 * 1024 * 1024)))
    return tile, grid_r, vmem_limit


def rotary_positional_encoding(x, base: int = 10000):
    """x: (batch, seq_len, emb_dim) -> same shape/dtype."""
    B, S, E = x.shape
    if E % 2 != 0:
        raise ValueError("emb_dim must be even for rotary pairing")

    # Lane-dense layout selection.
    if E % 128 == 0:
        flatten, rows, width = False, S, E
    elif (S * E) % 128 == 0:
        flatten, rows, width = True, (S * E) // 128, 128
    else:
        # Fallback: full-E lanes (legal: block last dim == array last dim),
        # stores may be lane-masked for E not a multiple of 128.
        flatten, rows, width = False, S, E

    table_dtype = jnp.bfloat16 if x.dtype == jnp.bfloat16 else jnp.float32
    cos, sin_signed = _rope_tables(S, E, base, table_dtype)
    if flatten:
        cos = cos.reshape(rows, width)
        sin_signed = sin_signed.reshape(rows, width)
        x_in = x.reshape(B, rows, width)
    else:
        x_in = x

    tile_r, grid_r, vmem_limit = _pick_tile(
        rows, width, x.dtype.itemsize, jnp.dtype(table_dtype).itemsize)

    # Megacore: shard the row axis when it has >= 2 tiles so each core keeps
    # batch-innermost table reuse; otherwise shard batch.
    if grid_r >= 2:
        semantics = ("parallel", "arbitrary")
    else:
        semantics = ("parallel", "parallel")

    out = pl.pallas_call(
        _rope_kernel,
        out_shape=jax.ShapeDtypeStruct((B, rows, width), x.dtype),
        grid=(grid_r, B),
        in_specs=[
            # x tile: changes every grid step (ragged last row-tile is
            # masked by Pallas; elementwise math makes padding harmless).
            pl.BlockSpec((None, tile_r, width), lambda r, b: (b, r, 0)),
            # cos / sin tables: block index depends only on the row tile, so
            # with batch innermost they are DMA'd once per tile and reused.
            pl.BlockSpec((tile_r, width), lambda r, b: (r, 0)),
            pl.BlockSpec((tile_r, width), lambda r, b: (r, 0)),
        ],
        out_specs=pl.BlockSpec((None, tile_r, width), lambda r, b: (b, r, 0)),
        compiler_params=pltpu.CompilerParams(
            dimension_semantics=semantics,
            vmem_limit_bytes=vmem_limit),
    )(x_in, cos, sin_signed)

    if flatten:
        out = out.reshape(B, S, E)
    return out


def _rope_reference(x, base: int = 10000):
    """Pure-JAX reference with identical (intended) semantics."""
    B, S, E = x.shape
    pos = jnp.arange(S, dtype=jnp.float32)[:, None]
    k = jnp.arange(E)
    inv_freq = jnp.float32(base) ** (-2.0 * (k // 2).astype(jnp.float32) / E)
    theta = pos * inv_freq
    cos = jnp.cos(theta)
    sin = jnp.sin(theta)
    sin_x = jnp.zeros_like(x)
    sin_x = sin_x.at[..., 0::2].set(-x[..., 1::2])
    sin_x = sin_x.at[..., 1::2].set(x[..., 0::2])
    return x * cos + sin_x * sin


if __name__ == "__main__":
    # Module has no learnable parameters (only `base`), so nothing to init.
    key = jax.random.PRNGKey(0)
    B, S, E = 2, 8, 32
    x = jax.random.normal(key, (B, S, E), dtype=jnp.float32)

    out = rotary_positional_encoding(x, base=10000)
    out = jax.block_until_ready(out)

    ref = _rope_reference(x, base=10000)
    np.testing.assert_allclose(np.asarray(out), np.asarray(ref),
                               rtol=1e-5, atol=1e-5)
    assert out.shape == (B, S, E) and out.dtype == x.dtype
    print("KERNEL_OK")
</pallas_src>

<mosaic_0001>
module attributes {stable_mosaic.version = 11 : i64} {
  func.func @_rope_kernel(%arg0: i32, %arg1: i32, %arg2: memref<1x2x128xf32, #tpu.memory_space<vmem>>, %arg3: memref<2x128xf32, #tpu.memory_space<vmem>>, %arg4: memref<2x128xf32, #tpu.memory_space<vmem>>, %arg5: memref<1x2x128xf32, #tpu.memory_space<vmem>>) attributes {dimension_semantics = [#tpu.dimension_semantics<parallel>, #tpu.dimension_semantics<parallel>], iteration_bounds = array<i64: 1, 2>, scalar_prefetch = 0 : i64, scratch_operands = 0 : i64, tpu.core_type = #tpu.core_type<tc>, window_params = [{transform_indices = @transform_0, window_bounds = array<i64: 1, 2, 128>}, {transform_indices = @transform_1, window_bounds = array<i64: 2, 128>}, {transform_indices = @transform_2, window_bounds = array<i64: 2, 128>}, {transform_indices = @transform_3, window_bounds = array<i64: 1, 2, 128>}]} {
    %c0 = arith.constant 0 : index
    %c0_0 = arith.constant 0 : index
    %c0_1 = arith.constant 0 : index
    %0 = vector.load %arg2[%c0, %c0_0, %c0_1] : memref<1x2x128xf32, #tpu.memory_space<vmem>>, vector<1x2x128xf32>
    %1 = vector.shape_cast %0 : vector<1x2x128xf32> to vector<2x128xf32>
    %c127_i32 = arith.constant 127 : i32
    %2 = tpu.dynamic_rotate %1 by %c127_i32 dim 1 : vector<2x128xf32>, i32 -> vector<2x128xf32>
    %c1_i32 = arith.constant 1 : i32
    %3 = tpu.dynamic_rotate %1 by %c1_i32 dim 1 : vector<2x128xf32>, i32 -> vector<2x128xf32>
    %4 = tpu.iota {dimensions = array<i32: 1>} : vector<2x128xi32>
    %c1_i32_2 = arith.constant 1 : i32
    %5 = vector.broadcast %c1_i32_2 : i32 to vector<2x128xi32>
    %6 = arith.andi %4, %5 : vector<2x128xi32>
    %c0_i32 = arith.constant 0 : i32
    %7 = vector.broadcast %c0_i32 : i32 to vector<2x128xi32>
    %8 = arith.cmpi eq, %6, %7 : vector<2x128xi32>
    %9 = arith.select %8, %2, %3 : vector<2x128xi1>, vector<2x128xf32>
    %c0_3 = arith.constant 0 : index
    %c0_4 = arith.constant 0 : index
    %10 = vector.load %arg3[%c0_3, %c0_4] : memref<2x128xf32, #tpu.memory_space<vmem>>, vector<2x128xf32>
    %11 = arith.mulf %1, %10 : vector<2x128xf32>
    %c0_5 = arith.constant 0 : index
    %c0_6 = arith.constant 0 : index
    %12 = vector.load %arg4[%c0_5, %c0_6] : memref<2x128xf32, #tpu.memory_space<vmem>>, vector<2x128xf32>
    %13 = arith.mulf %9, %12 : vector<2x128xf32>
    %14 = arith.addf %11, %13 : vector<2x128xf32>
    %c0_7 = arith.constant 0 : index
    %c0_8 = arith.constant 0 : index
    %c0_9 = arith.constant 0 : index
    %15 = vector.load %arg5[%c0_7, %c0_8, %c0_9] : memref<1x2x128xf32, #tpu.memory_space<vmem>>, vector<1x2x128xf32>
    %16 = vector.shape_cast %15 : vector<1x2x128xf32> to vector<2x128xf32>
    %17 = vector.shape_cast %14 : vector<2x128xf32> to vector<1x2x128xf32>
    tpu.vector_store %arg5[%c0_7, %c0_8, %c0_9], %17 {strides = array<i32>} : memref<1x2x128xf32, #tpu.memory_space<vmem>>, vector<1x2x128xf32>,
    return
  }
  func.func @transform_0(%arg0: i32, %arg1: i32) -> (i32, i32, i32) {
    %c0_i32 = arith.constant 0 : i32
    %c0_i32_0 = arith.constant 0 : i32
    return %arg1, %arg0, %c0_i32 : i32, i32, i32
  }
  func.func @transform_1(%arg0: i32, %arg1: i32) -> (i32, i32) {
    %c0_i32 = arith.constant 0 : i32
    %c0_i32_0 = arith.constant 0 : i32
    return %arg0, %c0_i32 : i32, i32
  }
  func.func @transform_2(%arg0: i32, %arg1: i32) -> (i32, i32) {
    %c0_i32 = arith.constant 0 : i32
    %c0_i32_0 = arith.constant 0 : i32
    return %arg0, %c0_i32 : i32, i32
  }
  func.func @transform_3(%arg0: i32, %arg1: i32) -> (i32, i32, i32) {
    %c0_i32 = arith.constant 0 : i32
    %c0_i32_0 = arith.constant 0 : i32
    return %arg1, %arg0, %c0_i32 : i32, i32, i32
  }
}

</mosaic_0001>

<bundles_post_ra>
// kernel: tpu_custom_call.1
= control target key start
LH: loop header
LB: loop body
LE: loop exit
PB: predicated region body
PF: predicated region fallthrough
CT: control target
= control target key end

     0   :  { %8 = vsyncpa [#allocation3], 0  ;;  %s830_s0 = inlined_call_operand.hbm [shape: f32[2,2,128], index: 0, kind: input, shape index: {}]   ;;  %s831_s1 = inlined_call_operand.hbm [shape: f32[2,128], index: 1, kind: input, shape index: {}]   ;;  %s832_s2 = inlined_call_operand.hbm [shape: f32[2,128], index: 2, kind: input, shape index: {}]   ;;  %s833_s3 = inlined_call_operand.hbm [shape: f32[2,2,128], index: 3, kind: output, shape index: {}]  }
   0x1   :  { %10 = vsyncpa [#allocation3 + $0x1], 0 }
   0x2   :  { %11 = vsyncpa [#allocation6], 0 }
   0x3   :  { %12 = vsyncpa [#allocation4], 0 }
   0x4   :  { %14 = vsyncpa [#allocation4 + $0x1], 0  ;;  %s688_s12 = smov 0   ;;  %s690_s13 = smov 0  }
   0x5   :  { %s692_s14 = smov 0   ;;  %s694_s15 = smov 0  }
   0x6   :  { %s696_s16 = smov 0   ;;  %s698_s17 = smov 0  }
   0x7 LB: > { %s384_s18 = sadd.s32 4294967295, %s662_s17   ;;  %s385_s19 = sadd.s32 4294967294, %s662_s17   ;;  %s662_s17 = sphi %s698_s17, %s20_s17   ;;  %s658_s16 = sphi %s696_s16, %s843_s16   ;;  %s654_s15 = sphi %s694_s15, %s842_s15   ;;  %s650_s14 = sphi %s692_s14, %s841_s14   ;;  %s646_s13 = sphi %s690_s13, %s840_s13   ;;  %s642_s12 = sphi %s688_s12, %s839_s12  }
   0x8   : > { %p54_p0 = scmp.ne.s32.totalorder %s646_s13, %s642_s12  ;;  %p722_p1 = scmp.eq.s32.totalorder %s384_s18, 0 }
   0x9   : > { %p138_p2 = scmp.eq.s32.totalorder %s385_s19, 1  ;;  %p386_p4 = scmp.ge.s32.totalorder %s662_s17, 1 }
   0xa   : > { %p728_p3 = por %p722_p1, %p54_p0  ;;  %p145_p6 = scmp.lt.s32.totalorder %s662_s17, 3 }
   0xb   : > { %p733_p5 = por %p138_p2, %p54_p0  ;;  %s159_s25 = sshll.u32 %s831_s1, 4  ;;  %s160_s25 = int_to_ptr.hbm [resolvable:$true] %s159_s25 }
   0xc   : > { %p741_p7 = pnand %p386_p4, %p145_p6  ;;  %p389_p8 = scmp.ge.s32.totalorder %s662_s17, 2 }
   0xd   : > { %s664_s27 = smov [#allocation5]   ;;  %s173_s4 = sshll.u32 %s832_s2, 4  ;;  %s174_s4 = int_to_ptr.hbm [resolvable:$true] %s173_s4 }
   0xe   : > { %p413_p9 = pneg %p741_p7  ;;  %s161_s28 = sshll.u32 %s664_s27, 4  ;;  %s162_s28 = int_to_ptr.vmem [resolvable:$true] %s161_s28 }
   0xf   : > { %s665_s5 = smov [#allocation7]   ;;  %p132_p11 = scmp.eq.s32.totalorder %s384_s18, 1 }
  0x10   : > { %p414_p10 = pnand %p413_p9, %p722_p1  ;;  %s175_s6 = sshll.u32 %s665_s5, 4  ;;  %s176_s6 = int_to_ptr.vmem [resolvable:$true] %s175_s6 }
  0x11   : > { %s29_s7 = sadd.s32 1, %s658_s16  ;;  %s41_s8 = sadd.s32 1, %s650_s14 }
  0x12   : > { %416 = dma.hbm_to_vmem [thread:$0]  (!%p414_p10), %s160_s25, 32, %s162_s28, [#allocation6]  }
  0x13   : > { %419 = dma.hbm_to_vmem [thread:$0]  (!%p414_p10), %s174_s4, 32, %s176_s6, [#allocation6]  }
  0x14   : > { %p30_p12 = scmp.ge.s32.totalorder %s29_s7, 2  ;;  %p48_p13 = scmp.ne.s32.totalorder %s650_s14, %s646_s13 }
  0x15   : > { %p49_p0 = scmp.eq.s32.totalorder %s662_s17, 0  ;;  %p430_p4 = scmp.lt.s32.totalorder %s662_s17, 2 }
  0x16   : > { %s845_s7 = smov (%p30_p12, %s29_s7), 0  ;;  %p760_p2 = por %p132_p11, %p48_p13 }
  0x17   : > { %s36_s10 = ssub.s32 %s658_s16, %s845_s7  ;;  %s186_s11 = sand.u32 1, %s650_s14  }
  0x18   : > { %p39_p6 = scmp.eq.s32.totalorder %s36_s10, 0  ;;  %p50_p9 = por %p49_p0, %p48_p13 }
  0x19   : > { %s390_s19 = sshll.u32 %s186_s11, 1  ;;  %s391_s18 = sshll.u32 %s658_s16, 1 }
  0x1a   : > { %s770_s23 = scalar_select %p39_p6, %s650_s14, %s41_s8  }
  0x1b   : > { %s195_s27 = scalar_lea.hbm %s830_s0, %s391_s18  ;;  %s190_s29 = scalar_lea.vmem [#allocation2], %s390_s19 }
  0x1c   : > { %s197_s28 = sshll.u32 %s195_s27, 4  ;;  %s199_s30 = sshll.u32 %s190_s29, 4  ;;  %s198_s28 = int_to_ptr.hbm [resolvable:$true] %s197_s28  ;;  %s200_s30 = int_to_ptr.vmem [resolvable:$true] %s199_s30 }
  0x1d   : > { %p421_p10 = pnand %p430_p4, %p50_p9  ;;  %s187_s4 = scalar_lea.sflag [#allocation3], %s186_s11 }
  0x1e   : > { %208 = sbr.rel (%p741_p7) target bundleno = 170 (0xaa), region = 32  ;;  %s780_s5 = sand.u32 (!%p741_p7), 1, %s646_s13  }
  0x1f   : > { %423 = dma.hbm_to_vmem [thread:$0]  (!%p421_p10), %s198_s28, 32, %s200_s30, %s187_s4  }
  0x20   : > { %s393_s6 = sshll.u32 (!%p741_p7), %s780_s5, 1  ;;  %s211_s8 = scalar_lea.sflag (!%p741_p7), [#allocation3], %s780_s5 }
  0x21   : > { %s214_s10 = scalar_lea.vmem (!%p741_p7), [#allocation2], %s393_s6 }
  0x23   : > { %629 = dma.done.wait (%p728_p3), %s211_s8, 32  }
  0x24   : > { %631 = vsyncadd (%p728_p3), %s211_s8, 4294967264 }
  0x25   : > { %633 = dma.done.wait (%p722_p1), [#allocation6], 64  }
  0x26   : > { %635 = vsyncadd (%p722_p1), [#allocation6], 4294967232  ;;  %v248_v0 = vld [vmem:[%s214_s10] sm:$0x3]  ;;  %s666_s26 = smov 127   ;;  %s667_s11 = smov 1   ;;  %v253_v1 = vlaneseq }
  0x27   : > { %249 = vrot.lane.b32.xlu0 %v248_v0, %s666_s26  ;;  %s398_s19 = sshll.u32 %s654_s15, 1  ;;  %v258_v5 = vld [vmem:[#allocation5] sm:$0x3]  ;;  %v260_v6 = vld [vmem:[#allocation7] sm:$0x3]  ;;  %s247_s20 = scalar_lea.vmem [#allocation8], %s393_s6 }
  0x28   : > { %v254_v2 = vand.u32 127, %v253_v1  ;;  %s276_s24 = scalar_lea.hbm %s833_s3, %s398_s19  ;;  %v259_v7 = vmul.f32 %v258_v5, %v248_v0  ;;  %s278_s25 = sshll.u32 %s247_s20, 4  ;;  %s279_s25 = int_to_ptr.vmem [resolvable:$true] %s278_s25 }
  0x29   : > { %s280_s27 = sshll.u32 %s276_s24, 4  ;;  %s265_s15 = scalar_lea.sflag [#allocation4], %s780_s5  ;;  %s281_s27 = int_to_ptr.hbm [resolvable:$true] %s280_s27 }
  0x2a   : > { %v255_v4 = vand.u32 1, %v254_v2  ;;  %s590_s28 = sshra.s32 %s281_s27, 4  ;;  %s596_s8 = scalar_lea.hbm %s833_s3, 4  ;;  %s591_s28 = int_to_ptr.hbm [resolvable:$true] %s590_s28 }
  0x2b   : > { %s592_s29 = scalar_lea.hbm %s591_s28, 2  ;;  %p597_p11 = scmp.lt.s32.totalorder %s591_s28, %s833_s3 }
  0x2c   : > { %vm256_vm0 = vcmp.eq.s32.totalorder %v255_v4, 0  ;;  %p593_p1 = scmp.ne.s32.totalorder %s591_s28, %s592_s29  ;;  %p598_p12 = scmp.lt.s32.totalorder %s596_s8, %s592_s29 }
  0x2e   : > { %p594_p3 = pnand %p593_p1, %p760_p2  ;;  %p599_p13 = por %p598_p12, %p597_p11 }
  0x2f   : > { %251 = vrot.lane.b32.xlu0 %v248_v0, %s667_s11 }
  0x30   : > { %p595_p7 = pneg %p594_p3 }
  0x32   : > { %p600_p0 = pnand %p599_p13, %p595_p7 }
  0x99   : > { %v250_v3 = vpop.permute.xlu0 %249 }
  0xa1   : > { %v252_v8 = vpop.permute.xlu0 %251 }
  0xa2   : > { %v257_v9 = vsel %vm256_vm0, %v250_v3, %v252_v8 }
  0xa3   : > { %v261_v10 = vmul.f32 %v260_v6, %v257_v9 }
  0xa5   : > { %v262_v11 = vadd.f32 %v261_v10, %v259_v7 }
  0xa7   : > { %263 = vst [vmem:[%s247_s20] sm:$0x3] %v262_v11 }
  0xa8   : > { %603 = shalt.err (!%p600_p0)
}
  0xa9   : > { %411 = dma.vmem_to_hbm [thread:$0]  (%p760_p2), %s279_s25, 32, %s281_s27, %s265_s15  }
  0xaa PF: > { %s292_s5 = sand.u32 1, %s642_s12   ;;  %p425_p4 = pnand %p389_p8, %p733_p5 }
  0xab   : > { %s293_s26 = scalar_lea.sflag [#allocation4], %s292_s5 }
  0xac   : > { %p426_p6 = pneg %p425_p4 }
  0xae   : > { %637 = dma.done.wait (%p426_p6), %s293_s26, 32  }
  0xaf   : > { %639 = vsyncadd (%p426_p6), %s293_s26, 4294967264  ;;  %s20_s17 = sadd.s32 1, %s662_s17   ;;  %s839_s12 = smov %s646_s13 }
  0xb0   : > { %p17_p9 = scmp.ge.s32.totalorder %s20_s17, 4   ;;  %s840_s13 = smov %s650_s14 }
  0xb1   : > { %s841_s14 = smov %s770_s23  ;;  %s842_s15 = smov %s658_s16 }
  0xb2   : > { %s843_s16 = smov %s845_s7  ;;  %19 = sbr.rel (!%p17_p9) target bundleno = 7 (0x7), region = 87 }
  0xb7   :  { %299 = vsyncpa [#allocation3], 1 }
  0xb8   :  { %301 = vsyncpa [#allocation3 + $0x1], 1 }
  0xb9   :  { %302 = vsyncpa [#allocation6], 1 }
  0xba   :  { %303 = vsyncpa [#allocation4], 1 }
  0xbb   :  { %305 = vsyncpa [#allocation4 + $0x1], 1 }

</bundles_post_ra>
